<compile_context>
chip_gen: v7x
topology: tpu7x:2x2x1
jax: 0.10.0
libtpu: 0.0.40
codegen_flags: <defaults>
</compile_context>

<pallas_src>
import functools

import jax
import jax.numpy as jnp
from jax.experimental import pallas as pl
from jax.experimental.pallas import tpu as pltpu


def _round_up(x: int, m: int) -> int:
    return ((x + m - 1) // m) * m


_MASK31 = 0x7FFFFFFF  # 2^31 - 1


def _keep_mask(shape, row_offset, hidden_size, seed, dropout_p):
    """Deterministic dropout keep-mask from an int32 counter hash.

    Pure int32 ops (iota / mul / xor / shift / compare) so it lowers both on
    Mosaic and in CPU interpret mode.  The element id is global (tile offset +
    in-tile iota), so the mask is independent of the tiling and distinct per
    tile.  keep probability ~= 1 - dropout_p.
    """
    rows = jax.lax.broadcasted_iota(jnp.int32, shape, 0) + row_offset
    cols = jax.lax.broadcasted_iota(jnp.int32, shape, 1)
    x = rows * hidden_size + cols                       # unique global element id
    x = x ^ (seed * 0x27D4EB2F + 0x165667B1)            # fold in the seed
    x = (x ^ ((x & _MASK31) >> 15)) * 0x2C1B3C6D        # mix (logical shift via mask)
    x = (x ^ ((x & _MASK31) >> 12)) * 0x297A2D39
    x = x ^ ((x & _MASK31) >> 15)
    bits = x & _MASK31                                  # ~uniform in [0, 2^31)
    threshold = min(int(round(float(dropout_p) * float(1 << 31))), _MASK31)
    return bits >= threshold


def _nerda_head_kernel(seed_ref, h_ref, w_ref, b_ref, o_ref, *,
                       dropout_p: float, train: bool, hidden_size: int,
                       tile_m: int):
    """o = dropout(h) @ w + b on one (TILE_M, H) token tile.

    seed_ref : (1,) int32 in SMEM (scalar prefetch)
    h_ref    : (TILE_M, H)   compute dtype (bf16 or f32)
    w_ref    : (H, T_pad)    compute dtype, VMEM-resident across the grid
    b_ref    : (1, T_pad)    f32, VMEM-resident across the grid
    o_ref    : (TILE_M, T_pad) f32
    """
    h = h_ref[...]
    apply_dropout = bool(train) and float(dropout_p) > 0.0
    if apply_dropout:
        keep = _keep_mask(h.shape, pl.program_id(0) * tile_m, hidden_size,
                          seed_ref[0], dropout_p)
        h = jnp.where(keep, h, jnp.zeros_like(h))

    acc = jnp.dot(h, w_ref[...], preferred_element_type=jnp.float32)
    if apply_dropout:
        # Fold the inverted-dropout 1/(1-p) scale into the (small) f32 output
        # instead of scaling the wide (TILE_M, H) tensor.
        acc = acc * jnp.float32(1.0 / (1.0 - float(dropout_p)))
    o_ref[...] = acc + b_ref[...]


def nerda_tag_head(hidden, w_tags, b_tags, *, dropout_p=0.1, train=True,
                   seed=0, compute_dtype=jnp.bfloat16, tile_m=512):
    """dropout + Linear(H -> n_tags) applied to (B, S, H) hidden states."""
    B, S, H = hidden.shape
    T = w_tags.shape[1]
    M = B * S

    # Token tiling: multiple of 8 sublanes, capped by the requested tile.
    m8 = _round_up(M, 8)
    tm = _round_up(min(int(tile_m), m8), 8)
    m_pad = _round_up(M, tm)
    t_pad = _round_up(T, 128)  # lane-dense output / MXU-friendly N

    # Cast the hidden stream (the dominant HBM traffic) to the compute dtype
    # before the kernel; XLA fuses this into the producer.
    h2 = hidden.reshape(M, H).astype(compute_dtype)
    if m_pad != M:
        h2 = jnp.pad(h2, ((0, m_pad - M), (0, 0)))
    w = w_tags.astype(compute_dtype)
    b = b_tags.reshape(1, T).astype(jnp.float32)
    if t_pad != T:
        w = jnp.pad(w, ((0, 0), (0, t_pad - T)))
        b = jnp.pad(b, ((0, 0), (0, t_pad - T)))

    seed_arr = jnp.array([seed], dtype=jnp.int32)
    grid = (m_pad // tm,)

    kernel = functools.partial(
        _nerda_head_kernel,
        dropout_p=float(dropout_p), train=bool(train),
        hidden_size=int(H), tile_m=int(tm))

    out = pl.pallas_call(
        kernel,
        out_shape=jax.ShapeDtypeStruct((m_pad, t_pad), jnp.float32),
        grid_spec=pltpu.PrefetchScalarGridSpec(
            num_scalar_prefetch=1,  # dropout seed -> SMEM
            grid=grid,
            in_specs=[
                pl.BlockSpec((tm, H), lambda i, s: (i, 0)),       # hidden tile
                pl.BlockSpec((H, t_pad), lambda i, s: (0, 0)),    # resident weight
                pl.BlockSpec((1, t_pad), lambda i, s: (0, 0)),    # resident bias
            ],
            out_specs=pl.BlockSpec((tm, t_pad), lambda i, s: (i, 0)),
        ),
        compiler_params=pltpu.CompilerParams(
            dimension_semantics=("parallel",)),
    )(seed_arr, h2, w, b)

    return out[:M, :T].reshape(B, S, T)


# ----------------------------------------------------------------------------
# Synthetic deterministic "transformer" stand-in (plain JAX glue)
# ----------------------------------------------------------------------------
def synthetic_transformer_hidden(params, input_ids, token_type_ids):
    """Word + token-type + position embeddings, then LayerNorm -> (B, S, H)."""
    B, S = input_ids.shape
    emb = (params["word_emb"][input_ids]
           + params["type_emb"][token_type_ids]
           + params["pos_emb"][None, :S, :])
    mu = jnp.mean(emb, axis=-1, keepdims=True)
    var = jnp.var(emb, axis=-1, keepdims=True)
    return (emb - mu) / jnp.sqrt(var + 1e-12)


def init_params(hidden_size, n_tags, vocab_size, type_vocab_size, max_seq,
                seed=42):
    key = jax.random.PRNGKey(seed)
    k1, k2, k3, k4, k5 = jax.random.split(key, 5)
    return {
        "word_emb": jax.random.normal(k1, (vocab_size, hidden_size),
                                      jnp.float32) * 0.02,
        "type_emb": jax.random.normal(k2, (type_vocab_size, hidden_size),
                                      jnp.float32) * 0.02,
        "pos_emb": jax.random.normal(k3, (max_seq, hidden_size),
                                     jnp.float32) * 0.02,
        # nn.Linear(hidden_size, n_tags): torch weight is (n_tags, H);
        # store transposed (H, n_tags) so the kernel does h @ w directly.
        "w_tags": jax.random.normal(k4, (hidden_size, n_tags),
                                    jnp.float32) * 0.1,
        "b_tags": jax.random.normal(k5, (n_tags,), jnp.float32) * 0.01,
    }


def nerda_forward(params, input_ids, masks, token_type_ids, target_tags,
                  offsets, *, dropout_p=0.1, train=True, seed=0,
                  compute_dtype=jnp.bfloat16, tile_m=512):
    """Mirrors NERDANetwork.forward: target_tags / offsets are accepted but
    unused, exactly as in the PyTorch module."""
    del target_tags, offsets, masks  # masks consumed only by the real transformer
    hidden = synthetic_transformer_hidden(params, input_ids, token_type_ids)
    return nerda_tag_head(hidden, params["w_tags"], params["b_tags"],
                          dropout_p=dropout_p, train=train, seed=seed,
                          compute_dtype=compute_dtype, tile_m=tile_m)


# ----------------------------------------------------------------------------
if __name__ == "__main__":
    # Small shapes consistent with the module's forward.
    B, S, H = 2, 8, 32
    N_TAGS = 8
    VOCAB, TYPE_VOCAB = 100, 2

    params = init_params(H, N_TAGS, VOCAB, TYPE_VOCAB, max_seq=S, seed=42)

    key = jax.random.PRNGKey(0)
    k_ids, k_tt, k_tgt = jax.random.split(key, 3)
    input_ids = jax.random.randint(k_ids, (B, S), 0, VOCAB, dtype=jnp.int32)
    masks = jnp.ones((B, S), dtype=jnp.int32)
    token_type_ids = jax.random.randint(k_tt, (B, S), 0, TYPE_VOCAB,
                                        dtype=jnp.int32)
    target_tags = jax.random.randint(k_tgt, (B, S), 0, N_TAGS, dtype=jnp.int32)
    offsets = jnp.zeros((B, S), dtype=jnp.int32)

    # 1) Train-mode forward (bf16 compute, fused dropout) — primary run.
    out = nerda_forward(params, input_ids, masks, token_type_ids, target_tags,
                        offsets, dropout_p=0.1, train=True, seed=0)
    out = jax.block_until_ready(out)
    assert out.shape == (B, S, N_TAGS), out.shape
    assert bool(jnp.all(jnp.isfinite(out)))

    # 2) Eval-mode (dropout off) vs pure-JAX reference.
    ref_hidden = synthetic_transformer_hidden(params, input_ids, token_type_ids)
    ref = jnp.einsum("bsh,ht->bst", ref_hidden, params["w_tags"],
                     precision=jax.lax.Precision.HIGHEST) + params["b_tags"]

    got_f32 = jax.block_until_ready(
        nerda_forward(params, input_ids, masks, token_type_ids, target_tags,
                      offsets, dropout_p=0.1, train=False,
                      compute_dtype=jnp.float32))
    assert jnp.allclose(got_f32, ref, atol=5e-3, rtol=5e-3)

    got_bf16 = jax.block_until_ready(
        nerda_forward(params, input_ids, masks, token_type_ids, target_tags,
                      offsets, dropout_p=0.1, train=False,
                      compute_dtype=jnp.bfloat16))
    assert jnp.allclose(got_bf16, ref, atol=5e-2, rtol=5e-2)

    # 3) Dropout-path check (multi-tile grid): hidden = ones, w = 1/H, b = 0,
    #    p = 0.5 -> each output ~ mean of kept Bernoulli * 1/(1-p), mean ~= 1.
    Hs, Ts = 128, 8
    hid1 = jnp.ones((2, 512, Hs), jnp.float32)          # M = 1024 -> 2 tiles of 512
    w1 = jnp.full((Hs, Ts), 1.0 / Hs, jnp.float32)
    b1 = jnp.zeros((Ts,), jnp.float32)
    drop_out = jax.block_until_ready(
        nerda_tag_head(hid1, w1, b1, dropout_p=0.5, train=True, seed=7,
                       compute_dtype=jnp.float32))
    eval_out = jax.block_until_ready(
        nerda_tag_head(hid1, w1, b1, dropout_p=0.5, train=False,
                       compute_dtype=jnp.float32))
    assert bool(jnp.all(jnp.isfinite(drop_out)))
    assert not bool(jnp.allclose(drop_out, eval_out))    # masking actually happened
    assert abs(float(jnp.mean(drop_out)) - 1.0) < 0.05   # 1/(1-p) scaling / keep rate

    print("KERNEL_OK")
</pallas_src>

<mosaic_0001>
module attributes {stable_mosaic.version = 11 : i64} {
  func.func @_nerda_head_kernel(%arg0: i32, %arg1: memref<1xi32, #tpu.memory_space<smem>>, %arg2: memref<16x32xbf16, #tpu.memory_space<vmem>>, %arg3: memref<32x128xbf16, #tpu.memory_space<vmem>>, %arg4: memref<1x128xf32, #tpu.memory_space<vmem>>, %arg5: memref<16x128xf32, #tpu.memory_space<vmem>>) attributes {dimension_semantics = [#tpu.dimension_semantics<parallel>], iteration_bounds = array<i64: 1>, scalar_prefetch = 1 : i64, scratch_operands = 0 : i64, tpu.core_type = #tpu.core_type<tc>, window_params = [{transform_indices = @transform_0, window_bounds = array<i64: 16, 32>}, {pipeline_mode = #tpu.pipeline_mode<synchronous>, transform_indices = @transform_1, window_bounds = array<i64: 32, 128>}, {pipeline_mode = #tpu.pipeline_mode<synchronous>, transform_indices = @transform_2, window_bounds = array<i64: 1, 128>}, {transform_indices = @transform_3, window_bounds = array<i64: 16, 128>}]} {
    %c0 = arith.constant 0 : index
    %c0_0 = arith.constant 0 : index
    %0 = vector.load %arg2[%c0, %c0_0] : memref<16x32xbf16, #tpu.memory_space<vmem>>, vector<16x32xbf16>
    %c16_i32 = arith.constant 16 : i32
    %1 = arith.muli %arg0, %c16_i32 : i32
    %c0_1 = arith.constant 0 : index
    %2 = memref.load %arg1[%c0_1] : memref<1xi32, #tpu.memory_space<smem>>
    %3 = tpu.iota {dimensions = array<i32: 0>} : vector<16x32xi32>
    %4 = vector.broadcast %1 : i32 to vector<16x32xi32>
    %5 = arith.addi %3, %4 : vector<16x32xi32>
    %6 = tpu.iota {dimensions = array<i32: 1>} : vector<16x32xi32>
    %c32_i32 = arith.constant 32 : i32
    %7 = vector.broadcast %c32_i32 : i32 to vector<16x32xi32>
    %8 = arith.muli %5, %7 : vector<16x32xi32>
    %9 = arith.addi %8, %6 : vector<16x32xi32>
    %c668265263_i32 = arith.constant 668265263 : i32
    %10 = arith.muli %2, %c668265263_i32 : i32
    %c374761393_i32 = arith.constant 374761393 : i32
    %11 = arith.addi %10, %c374761393_i32 : i32
    %12 = vector.broadcast %11 : i32 to vector<16x32xi32>
    %13 = arith.xori %9, %12 : vector<16x32xi32>
    %c2147483647_i32 = arith.constant 2147483647 : i32
    %14 = vector.broadcast %c2147483647_i32 : i32 to vector<16x32xi32>
    %15 = arith.andi %13, %14 : vector<16x32xi32>
    %c15_i32 = arith.constant 15 : i32
    %16 = vector.broadcast %c15_i32 : i32 to vector<16x32xi32>
    %17 = arith.shrsi %15, %16 : vector<16x32xi32>
    %18 = arith.xori %13, %17 : vector<16x32xi32>
    %c739982445_i32 = arith.constant 739982445 : i32
    %19 = vector.broadcast %c739982445_i32 : i32 to vector<16x32xi32>
    %20 = arith.muli %18, %19 : vector<16x32xi32>
    %c2147483647_i32_2 = arith.constant 2147483647 : i32
    %21 = vector.broadcast %c2147483647_i32_2 : i32 to vector<16x32xi32>
    %22 = arith.andi %20, %21 : vector<16x32xi32>
    %c12_i32 = arith.constant 12 : i32
    %23 = vector.broadcast %c12_i32 : i32 to vector<16x32xi32>
    %24 = arith.shrsi %22, %23 : vector<16x32xi32>
    %25 = arith.xori %20, %24 : vector<16x32xi32>
    %c695872825_i32 = arith.constant 695872825 : i32
    %26 = vector.broadcast %c695872825_i32 : i32 to vector<16x32xi32>
    %27 = arith.muli %25, %26 : vector<16x32xi32>
    %c2147483647_i32_3 = arith.constant 2147483647 : i32
    %28 = vector.broadcast %c2147483647_i32_3 : i32 to vector<16x32xi32>
    %29 = arith.andi %27, %28 : vector<16x32xi32>
    %c15_i32_4 = arith.constant 15 : i32
    %30 = vector.broadcast %c15_i32_4 : i32 to vector<16x32xi32>
    %31 = arith.shrsi %29, %30 : vector<16x32xi32>
    %32 = arith.xori %27, %31 : vector<16x32xi32>
    %c2147483647_i32_5 = arith.constant 2147483647 : i32
    %33 = vector.broadcast %c2147483647_i32_5 : i32 to vector<16x32xi32>
    %34 = arith.andi %32, %33 : vector<16x32xi32>
    %c214748365_i32 = arith.constant 214748365 : i32
    %35 = vector.broadcast %c214748365_i32 : i32 to vector<16x32xi32>
    %36 = arith.cmpi sge, %34, %35 : vector<16x32xi32>
    %cst = arith.constant 0.000000e+00 : bf16
    %37 = vector.broadcast %cst : bf16 to vector<16x32xbf16>
    %38 = arith.select %36, %0, %37 : vector<16x32xi1>, vector<16x32xbf16>
    %c0_6 = arith.constant 0 : index
    %c0_7 = arith.constant 0 : index
    %39 = vector.load %arg3[%c0_6, %c0_7] : memref<32x128xbf16, #tpu.memory_space<vmem>>, vector<32x128xbf16>
    %cst_8 = arith.constant dense<0.000000e+00> : vector<16x128xf32>
    %40 = tpu.matmul %38, %39, %cst_8 {dimension_numbers = #tpu.dot_dimension_numbers<[1], [0], [0], [1], [0, 0, 1, 1], [], []>} : vector<16x32xbf16>, vector<32x128xbf16>, vector<16x128xf32> -> vector<16x128xf32>
    %cst_9 = arith.constant 1.11111116 : f32
    %41 = vector.broadcast %cst_9 : f32 to vector<16x128xf32>
    %42 = arith.mulf %40, %41 : vector<16x128xf32>
    %c0_10 = arith.constant 0 : index
    %c0_11 = arith.constant 0 : index
    %43 = vector.load %arg4[%c0_10, %c0_11] : memref<1x128xf32, #tpu.memory_space<vmem>>, vector<1x128xf32>
    %44 = vector.broadcast %43 : vector<1x128xf32> to vector<16x128xf32>
    %45 = arith.addf %42, %44 : vector<16x128xf32>
    %c0_12 = arith.constant 0 : index
    %c0_13 = arith.constant 0 : index
    %46 = vector.load %arg5[%c0_12, %c0_13] : memref<16x128xf32, #tpu.memory_space<vmem>>, vector<16x128xf32>
    tpu.vector_store %arg5[%c0_12, %c0_13], %45 {strides = array<i32>} : memref<16x128xf32, #tpu.memory_space<vmem>>, vector<16x128xf32>,
    return
  }
  func.func @transform_0(%arg0: i32, %arg1: memref<1xi32, #tpu.memory_space<smem>>) -> (i32, i32) {
    %c0_i32 = arith.constant 0 : i32
    %c0_i32_0 = arith.constant 0 : i32
    return %arg0, %c0_i32 : i32, i32
  }
  func.func @transform_1(%arg0: i32, %arg1: memref<1xi32, #tpu.memory_space<smem>>) -> (i32, i32) {
    %c0_i32 = arith.constant 0 : i32
    %c0_i32_0 = arith.constant 0 : i32
    %c0_i32_1 = arith.constant 0 : i32
    return %c0_i32, %c0_i32_0 : i32, i32
  }
  func.func @transform_2(%arg0: i32, %arg1: memref<1xi32, #tpu.memory_space<smem>>) -> (i32, i32) {
    %c0_i32 = arith.constant 0 : i32
    %c0_i32_0 = arith.constant 0 : i32
    %c0_i32_1 = arith.constant 0 : i32
    return %c0_i32, %c0_i32_0 : i32, i32
  }
  func.func @transform_3(%arg0: i32, %arg1: memref<1xi32, #tpu.memory_space<smem>>) -> (i32, i32) {
    %c0_i32 = arith.constant 0 : i32
    %c0_i32_0 = arith.constant 0 : i32
    return %arg0, %c0_i32 : i32, i32
  }
}

</mosaic_0001>

<bundles_post_ra>
// kernel: tpu_custom_call.1
= control target key start
LH: loop header
LB: loop body
LE: loop exit
PB: predicated region body
PF: predicated region fallthrough
CT: control target
= control target key end

     0   :  { %10 = vsyncpa [#allocation5], 0  ;;  %s369_s0 = inlined_call_operand.<no memory space> [shape: s32[1], index: 0, kind: input, shape index: {}]   ;;  %s370_s1 = inlined_call_operand.hbm [shape: bf16[16,32], index: 1, kind: input, shape index: {}]   ;;  %s371_s2 = inlined_call_operand.hbm [shape: bf16[32,128], index: 2, kind: input, shape index: {}]   ;;  %s372_s3 = inlined_call_operand.vmem [shape: f32[1,128], index: 3, kind: input, shape index: {}]   ;;  %s373_s4 = inlined_call_operand.hbm [shape: f32[16,128], index: 4, kind: output, shape index: {}]  }
   0x1   :  { %11 = vsyncpa [#allocation8], 0 }
   0x2   :  { %12 = vsyncpa [#allocation6], 0  ;;  %s293_s15 = smov [#allocation4]   ;;  %s221_s19 = scalar_lea.hbm %s370_s1, 128 }
   0x3   :  { %s18_s16 = sshll.u32 %s293_s15, 4  ;;  %p222_p0 = scmp.ne.s32.totalorder %s370_s1, %s221_s19  ;;  %s19_s16 = int_to_ptr.vmem [resolvable:$true] %s18_s16 }
   0x4   :  { %p225_p1 = scmp.lt.u32.totalorder %s221_s19, %s370_s1 }
   0x6   :  { %p227_p2 = pnand %p225_p1, %p222_p0 }
   0x8   :  { %230 = shalt.err (!%p227_p2)
}
   0x9   :  { %s231_s24 = scalar_lea.vmem %s19_s16, 128  ;;  %p236_p4 = scmp.lt.s32.totalorder %s19_s16, %s19_s16 }
   0xa   :  { %p232_p3 = scmp.ne.s32.totalorder %s19_s16, %s231_s24  ;;  %p237_p5 = scmp.lt.s32.totalorder %s231_s24, %s231_s24 }
   0xc   :  { %p238_p6 = por %p237_p5, %p236_p4 }
   0xe   :  { %p239_p7 = pnand %p238_p6, %p232_p3 }
  0x10   :  { %242 = shalt.err (!%p239_p7)
}
  0x11   :  { %s294_s25 = smov 64   ;;  %s295_s26 = smov 4  }
  0x12   :  { %24 = dma.hbm_to_vmem [thread:$0]  %s370_s1, 128, %s19_s16, [#allocation5], %s294_s25, %s294_s25, %s295_s26  }
  0x13   :  { %s296_s29 = smov [#allocation7]   ;;  %s243_s7 = scalar_lea.hbm %s371_s2, 256 }
  0x14   :  { %s30_s30 = sshll.u32 %s296_s29, 4  ;;  %p244_p8 = scmp.ne.s32.totalorder %s371_s2, %s243_s7  ;;  %s31_s30 = int_to_ptr.vmem [resolvable:$true] %s30_s30 }
  0x15   :  { %p247_p9 = scmp.lt.u32.totalorder %s243_s7, %s371_s2 }
  0x17   :  { %p249_p10 = pnand %p247_p9, %p244_p8 }
  0x19   :  { %252 = shalt.err (!%p249_p10)
}
  0x1a   :  { %s253_s12 = scalar_lea.vmem %s31_s30, 256  ;;  %p258_p12 = scmp.lt.s32.totalorder %s31_s30, %s31_s30 }
  0x1b   :  { %p254_p11 = scmp.ne.s32.totalorder %s31_s30, %s253_s12  ;;  %p259_p13 = scmp.lt.s32.totalorder %s253_s12, %s253_s12 }
  0x1d   :  { %p260_p0 = por %p259_p13, %p258_p12 }
  0x1f   :  { %p261_p1 = pnand %p260_p0, %p254_p11 }
  0x21   :  { %264 = shalt.err (!%p261_p1)
}
  0x22   :  { %36 = dma.hbm_to_vmem [thread:$0]  %s371_s2, 256, %s31_s30, [#allocation8], %s294_s25, %s294_s25, %s295_s26  }
  0x23   :  { %287 = dma.done.wait [#allocation5], 128  }
  0x24   :  { %288 = vsyncadd [#allocation5], 4294967168 }
  0x25   :  { %289 = dma.done.wait [#allocation8], 256  }
  0x26   :  { %290 = vsyncadd [#allocation8], 4294967040  ;;  %v50_v0 = vlaneseq  ;;  %s62_s16 = smul.u32 668265263, %s369_s0  ;;  %v297_v1 = vmov 0.0   ;;  %vm298_vm0 = vmmov 0  }
  0x27   :  { %202 = vmatprep.subr.bf16.mxu0 %v297_v1  ;;  %206 = vmatprep.mubr.msk.bf16.mxu0 %vm298_vm0, %v297_v1  ;;  %v219_v9 = vld [vmem:[#allocation7] sm:$0xff]   ;;  %v220_v12 = vld [vmem:[#allocation7 + $0x8] sm:$0xff]   ;;  %v46_v37 = vld [vmem:[#allocation4] sm:$0xf]  ;;  %vm118_vm5 = vcmask 261120   ;;  %s299_s18 = smov [#allocation9]  }
  0x28   :  { %v51_v2 = vshrl.u32 %v50_v0, 7  ;;  %v57_v3 = vand.u32 127, %v50_v0  ;;  %s63_s17 = sadd.s32 374761393, %s62_s16  ;;  %203 = vmatpush3.bf16.msra.mxu0 %v219_v9  ;;  %v47_v39 = vld [vmem:[#allocation4 + $0x4] sm:$0xf] }
  0x29   :  { %v64_v6 = vstv %s63_s17  ;;  %204 = vmatprep.subr.bf16.mxu0 %v297_v1  ;;  %v198_v44 = vld [vmem:[%s372_s3] ss:$0 sm:$0xff]  ;;  %s181_s19 = sshll.u32 %s299_s18, 4  ;;  %s182_s19 = int_to_ptr.vmem [resolvable:$true] %s181_s19 }
  0x2a   :  { %v52_v4 = vadd.s32 8, %v51_v2  ;;  %v58_v5 = vmul.u32 32, %v51_v2  ;;  %s265_s20 = scalar_lea.vmem %s182_s19, 256  ;;  %p270_p3 = scmp.lt.s32.totalorder %s182_s19, %s182_s19 }
  0x2b   :  { %p266_p2 = scmp.ne.s32.totalorder %s182_s19, %s265_s20  ;;  %p271_p4 = scmp.lt.s32.totalorder %s265_s20, %s265_s20 }
  0x2c   :  { %v59_v7 = vmul.u32 32, %v52_v4  ;;  %v60_v8 = vadd.s32 %v58_v5, %v57_v3  ;;  %205 = vmatpush3.bf16.msra.mxu0 %v220_v12 }
  0x2d   :  { %p272_p5 = por %p271_p4, %p270_p3 }
  0x2e   :  { %v61_v10 = vadd.s32 %v59_v7, %v57_v3  ;;  %v65_v11 = vxor.u32 %v64_v6, %v60_v8 }
  0x2f   :  { %p273_p6 = pnand %p272_p5, %p266_p2 }
  0x30   :  { %v66_v13 = vxor.u32 %v64_v6, %v61_v10  ;;  %v67_v14 = vand.u32 2147483647, %v65_v11 }
  0x32   :  { %v68_v15 = vand.u32 2147483647, %v66_v13  ;;  %v69_v16 = vshra.s32 %v67_v14, 15 }
  0x34   :  { %v70_v17 = vshra.s32 %v68_v15, 15  ;;  %v71_v18 = vxor.u32 %v69_v16, %v65_v11 }
  0x36   :  { %v72_v19 = vxor.u32 %v70_v17, %v66_v13  ;;  %v73_v20 = vmul.u32 739982445, %v71_v18 }
  0x38   :  { %v74_v21 = vmul.u32 739982445, %v72_v19  ;;  %v75_v22 = vand.u32 2147483647, %v73_v20 }
  0x3a   :  { %v76_v23 = vand.u32 2147483647, %v74_v21  ;;  %v77_v24 = vshra.s32 %v75_v22, 12 }
  0x3c   :  { %v78_v25 = vshra.s32 %v76_v23, 12  ;;  %v79_v26 = vxor.u32 %v77_v24, %v73_v20 }
  0x3e   :  { %v80_v27 = vxor.u32 %v78_v25, %v74_v21  ;;  %v81_v28 = vmul.u32 695872825, %v79_v26 }
  0x40   :  { %v82_v29 = vmul.u32 695872825, %v80_v27  ;;  %v83_v30 = vand.u32 2147483647, %v81_v28 }
  0x42   :  { %v84_v31 = vand.u32 2147483647, %v82_v29  ;;  %v85_v32 = vshra.s32 %v83_v30, 15 }
  0x44   :  { %v86_v33 = vshra.s32 %v84_v31, 15  ;;  %v87_v34 = vxor.u32 %v85_v32, %v81_v28 }
  0x46   :  { %v88_v35 = vxor.u32 %v86_v33, %v82_v29  ;;  %v89_v36 = vand.u32 2147483647, %v87_v34 }
  0x48   :  { %v90_v38 = vand.u32 2147483647, %v88_v35  ;;  %vm91_vm1 = vcmp.ge.s32.totalorder %v89_v36, 214748365 }
  0x49   :  { %vm93_vm2 = vmpackc.low %vm91_vm1, %vm91_vm1 }
  0x4a   :  { %vm92_vm3 = vcmp.ge.s32.totalorder %v90_v38, 214748365  ;;  %v95_v40 = vsel %vm93_vm2, %v46_v37, 0 }
  0x4b   :  { %vm94_vm4 = vmpackc.low %vm92_vm3, %vm92_vm3 }
  0x4c   :  { %v96_v41 = vsel %vm94_vm4, %v47_v39, 0 }
  0x4d   :  { %v194_v42 = vcombine.low %v95_v40, %v96_v41 }
  0x4f   :  { %207 = vmatmul.mubr.msk.bf16.vlgmr.msra.gmra.mrb[0].mxu0 %vm118_vm5, %v194_v42 }
 0x122   :  { %v156_v43 = vpop.f32.mrb[0].mxu0 }
 0x123   :  { %v163_v45 = vmul.f32 1.1111112, %v156_v43  ;;  %v208_v46 = vpop.f32.mrb[1].mxu0 }
 0x124   :  { %v159_v47 = vpop.f32.mrb[2].mxu0 }
 0x125   :  { %v172_v48 = vadd.f32 %v198_v44, %v163_v45  ;;  %v164_v49 = vmul.f32 1.1111112, %v159_v47  ;;  %v209_v50 = vpop.f32.mrb[3].mxu0 }
 0x127   :  { %174 = vst [vmem:[#allocation9] sm:$0xff] %v172_v48  ;;  %v173_v51 = vadd.f32 %v198_v44, %v164_v49 }
 0x129   :  { %175 = vst [vmem:[#allocation9 + $0x8] sm:$0xff] %v173_v51 }
 0x12a   :  { %276 = shalt.err (!%p273_p6)
}
 0x12b   :  { %s277_s22 = scalar_lea.hbm %s373_s4, 256 }
 0x12c   :  { %p278_p7 = scmp.ne.s32.totalorder %s373_s4, %s277_s22  ;;  %p281_p8 = scmp.lt.u32.totalorder %s277_s22, %s373_s4 }
 0x12e   :  { %p283_p9 = pnand %p281_p8, %p278_p7 }
 0x130   :  { %286 = shalt.err (!%p283_p9)
}
 0x131   :  { %s300_s27 = smov 128   ;;  %s301_s28 = smov 8  }
 0x132   :  { %187 = dma.vmem_to_hbm [thread:$0]  %s182_s19, 256, %s373_s4, [#allocation6], %s300_s27, %s300_s27, %s301_s28  }
 0x133   :  { %291 = dma.done.wait [#allocation6], 256  }
 0x134   :  { %292 = vsyncadd [#allocation6], 4294967040 }
 0x135   :  { %191 = vsyncpa [#allocation5], 1 }
 0x136   :  { %192 = vsyncpa [#allocation8], 1 }
 0x137   :  { %193 = vsyncpa [#allocation6], 1 }

</bundles_post_ra>
